<compile_context>
chip_gen: v5e
topology: v5e:2x2
jax: 0.10.0
libtpu: 0.0.40
codegen_flags: <defaults>
</compile_context>

<pallas_src>
import jax
import jax.numpy as jnp
from jax.experimental import pallas as pl
from jax.experimental.pallas import tpu as pltpu


def _norm_kernel(sb_ref, img_ref, out_ref):
    # sb_ref:  (Rb, 2) packed per-row constants: [:, 0] = 1/std, [:, 1] = -mean/std
    # img/out: (Rb, Tc) lane-dense tiles.
    scale = sb_ref[:, 0:1]
    bias = sb_ref[:, 1:2]
    out_ref[...] = img_ref[...] * scale + bias


def _round_down(x, m):
    return (x // m) * m


def _pick_block(dim, align, cap_elems):
    """Legal block size along one axis: a multiple of `align`, or full extent.

    Full extent whenever the whole axis fits the element budget (or the axis is
    shorter than `align`); otherwise the largest aligned size <= cap.
    """
    if dim <= align or dim <= cap_elems:
        return dim
    return max(align, _round_down(min(dim, cap_elems), align))


def _pick_tiles(R, L, itemsize, target_block_bytes):
    """Joint (Rb, Tc) selection so Rb * Tc * itemsize <= target_block_bytes
    (down to the minimum legal block) on every TPU generation."""
    budget = max(8 * 128, target_block_bytes // itemsize)  # elems per data block
    min_rb = min(R, 8)
    Tc = _pick_block(L, 128, max(128, budget // max(min_rb, 1)))
    Rb = _pick_block(R, 8, max(8, budget // max(Tc, 1)))
    return Rb, Tc


def _maybe_split_for_two_cores(R, L, Rb, Tc, itemsize):
    """Ensure >=2 grid steps along a 'parallel' axis for mid-sized problems so
    both v7x TensorCores get work; skip for tiny tensors where the extra
    grid-step overhead would dominate."""
    if pl.cdiv(R, Rb) * pl.cdiv(L, Tc) >= 2:
        return Rb, Tc
    if R * L * itemsize < 256 * 1024:      # too small for the split to pay off
        return Rb, Tc
    if R >= 16:                            # split rows first (keeps sb DMA dedupe)
        return max(8, _round_down((R + 1) // 2, 8)), Tc
    if L >= 256:
        return Rb, max(128, _round_down((L + 1) // 2, 128))
    return Rb, Tc


def normalization(img, mean, std, *, target_block_bytes=4 * 1024 * 1024):
    """(img - mean) / std with per-channel mean/std, NCHW layout.

    img:  (N, C, H, W) float32
    mean: (C,) float32
    std:  (C,) float32
    """
    N, C, H, W = img.shape
    dtype = img.dtype
    itemsize = jnp.dtype(dtype).itemsize

    mean = jnp.asarray(mean, dtype=dtype).reshape(C)
    std = jnp.asarray(std, dtype=dtype).reshape(C)

    # (img - mean) / std == img * (1/std) + (-mean/std) -> single FMA per elem.
    inv_std = 1.0 / std
    bias = -mean * inv_std

    # Lane-dense flattening: contiguous NCHW view -> (N*C, H*W).
    R = N * C
    L = H * W
    img2d = img.reshape(R, L)

    # Packed per-row constants: one tiny (R, 2) array -> single DMA stream,
    # deduped across the innermost lane-grid axis.  Row r = n*C + c -> channel c.
    sb = jnp.tile(jnp.stack([inv_std, bias], axis=-1), (N, 1))  # (R, 2)

    Rb, Tc = _pick_tiles(R, L, itemsize, target_block_bytes)
    Rb, Tc = _maybe_split_for_two_cores(R, L, Rb, Tc, itemsize)
    grid = (pl.cdiv(R, Rb), pl.cdiv(L, Tc))

    # VMEM actually resident: double-buffered input + output data blocks plus the
    # tiny packed-constant block, plus slack for Mosaic internal scratch.
    block_bytes = Rb * Tc * itemsize
    sb_bytes = Rb * 2 * itemsize
    vmem_limit = 4 * block_bytes + 2 * sb_bytes + 8 * 1024 * 1024
    vmem_limit = int(min(max(vmem_limit, 16 * 1024 * 1024), 48 * 1024 * 1024))

    cost = pl.CostEstimate(
        flops=2 * R * L,
        transcendentals=0,
        bytes_accessed=2 * R * L * itemsize + R * 2 * itemsize,
    )

    out2d = pl.pallas_call(
        _norm_kernel,
        out_shape=jax.ShapeDtypeStruct((R, L), dtype),
        grid=grid,
        in_specs=[
            pl.BlockSpec((Rb, 2), lambda i, j: (i, 0)),
            pl.BlockSpec((Rb, Tc), lambda i, j: (i, j)),
        ],
        out_specs=pl.BlockSpec((Rb, Tc), lambda i, j: (i, j)),
        compiler_params=pltpu.CompilerParams(
            dimension_semantics=("parallel", "parallel"),
            vmem_limit_bytes=vmem_limit,
        ),
        cost_estimate=cost,
    )(sb, img2d)

    return out2d.reshape(N, C, H, W)
    # TODO(synk): standalone this op is HBM-bound; the remaining >10% wins are
    # bf16 output (if the consumer allows) or fusing into the adjacent kernel.


if __name__ == "__main__":
    key = jax.random.PRNGKey(0)
    N, C, H, W = 2, 4, 16, 16

    img = jax.random.normal(key, (N, C, H, W), dtype=jnp.float32)
    # Deterministic per-channel normalization constants (module __init__ args).
    mean = jnp.array([0.485, 0.456, 0.406, 0.5], dtype=jnp.float32)
    std = jnp.array([0.229, 0.224, 0.225, 0.25], dtype=jnp.float32)

    out = normalization(img, mean, std)
    out = jax.block_until_ready(out)

    # Reference check in plain JAX (PyTorch broadcast semantics: (C,1,1)).
    ref = (img - mean.reshape(1, C, 1, 1)) / std.reshape(1, C, 1, 1)
    assert out.shape == (N, C, H, W)
    # FMA rewrite (x*inv_std + bias) differs from (x-mean)/std by ~1 ulp.
    assert jnp.allclose(out, ref, atol=1e-5, rtol=1e-5)

    print("KERNEL_OK")
</pallas_src>

<mosaic_0001>
module attributes {stable_mosaic.version = 11 : i64} {
  func.func @_norm_kernel(%arg0: i32, %arg1: i32, %arg2: memref<8x2xf32, #tpu.memory_space<vmem>>, %arg3: memref<8x256xf32, #tpu.memory_space<vmem>>, %arg4: memref<8x256xf32, #tpu.memory_space<vmem>>) attributes {dimension_semantics = [#tpu.dimension_semantics<parallel>, #tpu.dimension_semantics<parallel>], iteration_bounds = array<i64: 1, 1>, scalar_prefetch = 0 : i64, scratch_operands = 0 : i64, tpu.core_type = #tpu.core_type<tc>, window_params = [{transform_indices = @transform_0, window_bounds = array<i64: 8, 2>}, {transform_indices = @transform_1, window_bounds = array<i64: 8, 256>}, {transform_indices = @transform_2, window_bounds = array<i64: 8, 256>}]} {
    %c0 = arith.constant 0 : index
    %c0_0 = arith.constant 0 : index
    %0 = vector.load %arg2[%c0, %c0_0] : memref<8x2xf32, #tpu.memory_space<vmem>>, vector<8x1xf32>
    %c0_1 = arith.constant 0 : index
    %c1 = arith.constant 1 : index
    %1 = vector.load %arg2[%c0_1, %c1] : memref<8x2xf32, #tpu.memory_space<vmem>>, vector<8x1xf32>
    %c0_2 = arith.constant 0 : index
    %c0_3 = arith.constant 0 : index
    %2 = vector.load %arg3[%c0_2, %c0_3] : memref<8x256xf32, #tpu.memory_space<vmem>>, vector<8x256xf32>
    %3 = vector.broadcast %0 : vector<8x1xf32> to vector<8x256xf32>
    %4 = arith.mulf %2, %3 : vector<8x256xf32>
    %5 = vector.broadcast %1 : vector<8x1xf32> to vector<8x256xf32>
    %6 = arith.addf %4, %5 : vector<8x256xf32>
    %c0_4 = arith.constant 0 : index
    %c0_5 = arith.constant 0 : index
    %7 = vector.load %arg4[%c0_4, %c0_5] : memref<8x256xf32, #tpu.memory_space<vmem>>, vector<8x256xf32>
    tpu.vector_store %arg4[%c0_4, %c0_5], %6 {strides = array<i32>} : memref<8x256xf32, #tpu.memory_space<vmem>>, vector<8x256xf32>,
    return
  }
  func.func @transform_0(%arg0: i32, %arg1: i32) -> (i32, i32) {
    %c0_i32 = arith.constant 0 : i32
    %c0_i32_0 = arith.constant 0 : i32
    return %arg0, %c0_i32 : i32, i32
  }
  func.func @transform_1(%arg0: i32, %arg1: i32) -> (i32, i32) {
    %c0_i32 = arith.constant 0 : i32
    return %arg0, %arg1 : i32, i32
  }
  func.func @transform_2(%arg0: i32, %arg1: i32) -> (i32, i32) {
    %c0_i32 = arith.constant 0 : i32
    return %arg0, %arg1 : i32, i32
  }
}

</mosaic_0001>

<bundles_post_ra>
// kernel: tpu_custom_call.1
= control target key start
LH: loop header
LB: loop body
LE: loop exit
PB: predicated region body
PF: predicated region fallthrough
CT: control target
= control target key end

     0   :  { %7 = vsyncpa [#allocation3], 0  ;;  %s147_s0 = inlined_call_operand.vmem [shape: f32[8,2], index: 0, kind: input, shape index: {}]   ;;  %s148_s1 = inlined_call_operand.hbm [shape: f32[8,256], index: 1, kind: input, shape index: {}]   ;;  %s149_s2 = inlined_call_operand.hbm [shape: f32[8,256], index: 2, kind: output, shape index: {}]  }
   0x1   :  { %8 = vsyncpa [#allocation4], 0  ;;  %s16_s11 = sshll.u32 %s148_s1, 4  ;;  %s119_s12 = smov [#allocation2]   ;;  %s17_s11 = int_to_ptr.hbm [resolvable:$true] %s16_s11 }
   0x2   :  { %s18_s13 = sshll.u32 %s119_s12, 4  ;;  %s19_s13 = int_to_ptr.vmem [resolvable:$true] %s18_s13 }
   0x3   :  { %21 = dma.hbm_to_vmem [thread:$0]  %s17_s11, 256, %s19_s13, [#allocation3]  }
   0x4   :  { %115 = dma.done.wait [#allocation3], 256  }
   0x5   :  { %116 = vsyncadd [#allocation3], 4294967040  ;;  %v120_v0 = vmov 0   ;;  %v26_v1 = vld [vmem:[%s147_s0] sm:$0xff]  ;;  %v121_v2 = vmov 1   ;;  %v28_v5 = vld [vmem:[#allocation2 + $0x8] sm:$0xff] }
   0x6   :  { %65 = vset.pattern.permute.xlu0 %v120_v0  ;;  %v27_v4 = vld [vmem:[#allocation2] sm:$0xff]  ;;  %s122_s1 = smov [#allocation5]   ;;  %s51_s19 = sshll.u32 %s149_s2, 4  ;;  %s52_s19 = int_to_ptr.hbm [resolvable:$true] %s51_s19 }
   0x7   :  { %31 = vperm.xlu0 %65, %v26_v1   ;;  %s49_s16 = sshll.u32 %s122_s1, 4  ;;  %s50_s16 = int_to_ptr.vmem [resolvable:$true] %s49_s16 }
   0xf   :  { %66 = vset.pattern.permute.xlu0 %v121_v2 }
  0x10   :  { %37 = vperm.xlu0 %66, %v26_v1  }
  0x79   :  { %v32_v3 = vpop.permute.xlu0 %31 }
  0x7a   :  { %v34_v6 = vmul.f32 %v32_v3, %v27_v4  ;;  %v35_v7 = vmul.f32 %v32_v3, %v28_v5 }
  0x82   :  { %v38_v8 = vpop.permute.xlu0 %37 }
  0x83   :  { %v40_v9 = vadd.f32 %v38_v8, %v34_v6  ;;  %v41_v10 = vadd.f32 %v38_v8, %v35_v7 }
  0x85   :  { %42 = vst [vmem:[#allocation5] sm:$0xff] %v40_v9 }
  0x86   :  { %43 = vst [vmem:[#allocation5 + $0x8] sm:$0xff] %v41_v10 }
  0x87   :  { %54 = dma.vmem_to_hbm [thread:$0]  %s50_s16, 256, %s52_s19, [#allocation4]  }
  0x88   :  { %117 = dma.done.wait [#allocation4], 256  }
  0x89   :  { %118 = vsyncadd [#allocation4], 4294967040 }
  0x8a   :  { %59 = vsyncpa [#allocation3], 1 }
  0x8b   :  { %60 = vsyncpa [#allocation4], 1 }

</bundles_post_ra>
